<compile_context>
chip_gen: v6e
topology: v6e:2x2x1
jax: 0.10.0
libtpu: 0.0.40
codegen_flags: <defaults>
</compile_context>

<pallas_src>
import functools

import jax
import jax.numpy as jnp
from jax.experimental import pallas as pl
from jax.experimental.pallas import tpu as pltpu

_BN_EPS = 1e-5
_ACT = jnp.bfloat16              # HBM-streamed activations / MXU operands
_CPAD = 128                      # trunk channel padding (one full lane width)
_VMEM = pl.BlockSpec(memory_space=pltpu.MemorySpace.VMEM)


def _round_up(x, m):
    return (x + m - 1) // m * m


# ---------------------------------------------------------------------------
# pltpu.roll sign-convention probe (resolved once on device, outside jit).
# ---------------------------------------------------------------------------
@functools.lru_cache(maxsize=None)
def _roll_matches_jnp():
    """True if pltpu.roll follows jnp.roll semantics: out[i] = in[(i - shift) % n]."""
    def k(x_ref, o_ref):
        o_ref[...] = pltpu.roll(x_ref[...], 1, 0)

    x = jnp.broadcast_to(jnp.arange(8, dtype=jnp.float32)[:, None], (8, 128))
    y = pl.pallas_call(k, out_shape=jax.ShapeDtypeStruct((8, 128), jnp.float32),
                       in_specs=[_VMEM], out_specs=_VMEM)(x)
    return bool(jax.block_until_ready(y)[0, 0] == 7.0)


def _shift_up(x, s):
    """Return y with y[p] = x[(p + s) % n] along axis 0 (static integer s)."""
    if s == 0:
        return x
    n = x.shape[0]
    amt = (-s) % n if _roll_matches_jnp() else s % n
    return pltpu.roll(x, amt, 0)


# ---------------------------------------------------------------------------
# Kernel 1: stem conv (7x7, s=2, p=3) + folded BN + ReLU  (im2col + tiled matmul)
# ---------------------------------------------------------------------------
def _matmul_bias_relu_kernel(x_ref, w_ref, b_ref, o_ref):
    acc = jnp.dot(x_ref[...], w_ref[...], preferred_element_type=jnp.float32)
    acc = jnp.maximum(acc + b_ref[...], 0.0)
    o_ref[...] = acc.astype(o_ref.dtype)


def _im2col(x, kh, kw, stride, padding):
    """x: [N,H,W,C] -> patches [N*Ho*Wo, kh*kw*C] ordered (dy, dx, ci)."""
    N, H, W, C = x.shape
    Ho = (H + 2 * padding - kh) // stride + 1
    Wo = (W + 2 * padding - kw) // stride + 1
    xp = jnp.pad(x, ((0, 0), (padding, padding), (padding, padding), (0, 0)))
    cols = []
    for dy in range(kh):
        for dx in range(kw):
            cols.append(xp[:, dy:dy + stride * (Ho - 1) + 1:stride,
                            dx:dx + stride * (Wo - 1) + 1:stride, :])
    patches = jnp.stack(cols, axis=3).reshape(N * Ho * Wo, kh * kw * C)
    return patches, (N, Ho, Wo)


def stem_conv_bn_relu(x_nhwc, w2d, bias, *, kh=7, kw=7, stride=2, padding=3,
                      tile_m=512):
    """Prepacked (BN-folded, 128-lane padded) stem weights; grid-tiled MXU matmul."""
    patches, (N, Ho, Wo) = _im2col(x_nhwc, kh, kw, stride, padding)
    M, K = patches.shape
    Kp, Cp = w2d.shape
    assert Kp >= K and Kp % 128 == 0 and Cp % 128 == 0
    tm = min(tile_m, _round_up(M, 8))
    Mp = _round_up(M, tm)
    patches = jnp.pad(patches, ((0, Mp - M), (0, Kp - K))).astype(_ACT)

    out = pl.pallas_call(
        _matmul_bias_relu_kernel,
        grid=(Mp // tm,),
        in_specs=[pl.BlockSpec((tm, Kp), lambda i: (i, 0)),
                  pl.BlockSpec((Kp, Cp), lambda i: (0, 0)),
                  pl.BlockSpec((1, Cp), lambda i: (0, 0))],
        out_specs=pl.BlockSpec((tm, Cp), lambda i: (i, 0)),
        out_shape=jax.ShapeDtypeStruct((Mp, Cp), _ACT),
        compiler_params=pltpu.CompilerParams(
            dimension_semantics=("parallel",)),
    )(patches, w2d, bias)
    return out[:M].reshape(N, Ho, Wo, Cp)


# ---------------------------------------------------------------------------
# MaxPool2d(3, stride=2, padding=1): XLA-fused maximum tree over 9 shifted views
# ---------------------------------------------------------------------------
def maxpool_3x3_s2_p1(x):
    N, H, W, C = x.shape
    Ho = (H - 1) // 2 + 1
    Wo = (W - 1) // 2 + 1
    xp = jnp.pad(x, ((0, 0), (1, 1), (1, 1), (0, 0)), constant_values=-jnp.inf)
    out = None
    for dy in range(3):
        for dx in range(3):
            v = xp[:, dy:dy + 2 * Ho - 1:2, dx:dx + 2 * Wo - 1:2, :]
            out = v if out is None else jnp.maximum(out, v)
    return out


# ---------------------------------------------------------------------------
# Padded-flat geometry for the fused trunk (batch folded into the M axis)
# ---------------------------------------------------------------------------
class _Geom:
    def __init__(self, N, H, W):
        self.N, self.H, self.W = N, H, W
        self.Hp, self.Wp = H + 2, W + 2
        self.P = self.Hp * self.Wp
        self.Pa = _round_up(self.P, 8)          # sublane-aligned rows per image
        self.M = N * self.Pa                    # batch folded into M (review #4)
        # Roll-reach safety: the farthest 3x3 tap (|shift| = Wp+1) read from any
        # interior row must stay inside that image's own Pa-row slot, so rolls
        # can never pull another image's interior rows into this image.
        assert self.H * self.Wp + self.W + (self.Wp + 1) <= self.P - 1

        hh = jnp.arange(self.Hp)[:, None]
        ww = jnp.arange(self.Wp)[None, :]
        interior = ((hh >= 1) & (hh <= H) & (ww >= 1) & (ww <= W)).reshape(self.P)
        m = jnp.pad(interior.astype(jnp.float32), (0, self.Pa - self.P))
        self.mask = jnp.tile(m, (N,)).reshape(self.M, 1)                 # [M, 1] f32
        # Per-image row selector for the fused average pool: [N, M], 0/1 (exact in bf16)
        self.sel = jnp.kron(jnp.eye(N, dtype=jnp.float32),
                            jnp.ones((1, self.Pa), jnp.float32)).astype(_ACT)

    def to_flat(self, x_nhwc):
        N, H, W, C = x_nhwc.shape
        xp = jnp.pad(x_nhwc, ((0, 0), (1, 1), (1, 1), (0, 0)))
        flat = xp.reshape(N, self.P, C)
        flat = jnp.pad(flat, ((0, 0), (0, self.Pa - self.P), (0, 0)))
        return flat.reshape(self.M, C).astype(_ACT)


# ---------------------------------------------------------------------------
# Kernel 2: fully fused residual trunk + avgpool + flatten + linear
# ---------------------------------------------------------------------------
def _trunk_head_kernel(x_ref, w3_ref, b3_ref, wd_ref, bd_ref, mask_ref, sel_ref,
                       fcw_ref, fcb_ref, o_ref, *, wp, block_has_ds, inv_hw):
    h = x_ref[...].astype(jnp.float32)          # [M, C] padded-flat, halo rows = 0
    mask = mask_ref[...]                        # [M, 1] f32 interior mask

    def conv3x3(inp, ci):
        # dx in {-1,0,+1}: 2 input rolls + lane-concat -> 3 matmuls with K = 3*C;
        # dy in {-1,0,+1}: only 2 f32 output rolls (review #2 / #6).
        xcat = jnp.concatenate(
            [_shift_up(inp, -1), inp, _shift_up(inp, +1)], axis=1).astype(_ACT)
        acc = None
        for dy in range(3):
            y = jnp.dot(xcat, w3_ref[3 * ci + dy],
                        preferred_element_type=jnp.float32)
            y = _shift_up(y, (dy - 1) * wp)
            acc = y if acc is None else acc + y
        return acc + b3_ref[ci]                 # folded-BN bias

    ci = 0
    di = 0
    for has_ds in block_has_ds:                 # static unroll over every BasicBlock
        res = h
        h = jnp.maximum(conv3x3(h, ci), 0.0) * mask       # conv1+bn1+relu, re-zero halo
        ci += 1
        h = conv3x3(h, ci)                                # conv2+bn2
        ci += 1
        if has_ds:                                        # fused 1x1-conv+bn shortcut
            res = jnp.dot(res.astype(_ACT), wd_ref[di],
                          preferred_element_type=jnp.float32) + bd_ref[di]
            di += 1
        h = jnp.maximum(h + res, 0.0) * mask              # residual add + relu, re-zero halo

    # Fused AdaptiveAvgPool2d((1,1)) + Flatten + Linear (review #11): halo rows are
    # zero so a per-image row-sum (one small matmul with the 0/1 selector) / (H*W)
    # is exactly the adaptive average pool.
    pooled = jnp.dot(sel_ref[...], h.astype(_ACT),
                     preferred_element_type=jnp.float32) * inv_hw          # [N, C]
    o_ref[...] = (jnp.dot(pooled.astype(_ACT), fcw_ref[...],
                          preferred_element_type=jnp.float32) + fcb_ref[...])


def trunk_and_head(xflat, arrays, geom, *, block_has_ds):
    assert arrays["w3"].shape[0] == 6 * len(block_has_ds)
    assert arrays["b3"].shape[0] == 2 * len(block_has_ds)
    ncp = arrays["fc_w"].shape[1]
    kernel = functools.partial(
        _trunk_head_kernel, wp=geom.Wp, block_has_ds=block_has_ds,
        inv_hw=1.0 / float(geom.H * geom.W))
    return pl.pallas_call(
        kernel,
        out_shape=jax.ShapeDtypeStruct((geom.N, ncp), jnp.float32),
        in_specs=[_VMEM] * 9,
        out_specs=_VMEM,
    )(xflat, arrays["w3"], arrays["b3"], arrays["wd"], arrays["bd"],
      geom.mask, geom.sel, arrays["fc_w"], arrays["fc_b"])


# ---------------------------------------------------------------------------
# One-time weight packing (BN fold, transpose, 128-lane pad, bf16 cast) — hoisted
# out of the per-forward path (review #7).
# ---------------------------------------------------------------------------
def _fold_bn(bn):
    gamma, beta, mean, var = bn
    scale = gamma / jnp.sqrt(var + _BN_EPS)
    bias = beta - mean * scale
    return scale, bias


def _prep_conv3x3_padded(w, bn):
    Cout, Cin, kh, kw = w.shape
    assert kh == 3 and kw == 3 and Cin <= _CPAD and Cout <= _CPAD
    scale, bias = _fold_bn(bn)
    taps = jnp.transpose(w, (2, 3, 1, 0)) * scale            # [3, 3, Cin, Cout]
    taps = jnp.pad(taps, ((0, 0), (0, 0), (0, _CPAD - Cin), (0, _CPAD - Cout)))
    w3 = taps.reshape(3, 3 * _CPAD, _CPAD).astype(_ACT)       # dy-grouped, K = (dx, cin)
    b3 = jnp.pad(bias, (0, _CPAD - Cout)).reshape(1, _CPAD).astype(jnp.float32)
    return w3, b3


def _prep_conv1x1_padded(w, bn):
    Cout, Cin, _, _ = w.shape
    assert Cin <= _CPAD and Cout <= _CPAD
    scale, bias = _fold_bn(bn)
    wd = jnp.transpose(w, (2, 3, 1, 0)).reshape(Cin, Cout) * scale
    wd = jnp.pad(wd, ((0, _CPAD - Cin), (0, _CPAD - Cout))).astype(_ACT)
    bd = jnp.pad(bias, (0, _CPAD - Cout)).reshape(1, _CPAD).astype(jnp.float32)
    return wd, bd


def pack_params(params):
    arrays = {}

    # --- stem: fold BN, transpose to (kh,kw,cin)->cout matrix, pad K and Cout ---
    Cout, Cin, kh, kw = params["conv1_w"].shape
    assert Cout <= _CPAD
    scale, bias = _fold_bn(params["bn1"])
    K = kh * kw * Cin
    w2d = jnp.transpose(params["conv1_w"], (2, 3, 1, 0)).reshape(K, Cout) * scale[None, :]
    Kp, Cp = _round_up(K, 128), _round_up(Cout, _CPAD)
    arrays["stem_w"] = jnp.pad(w2d, ((0, Kp - K), (0, Cp - Cout))).astype(_ACT)
    arrays["stem_b"] = jnp.pad(bias, (0, Cp - Cout)).reshape(1, Cp).astype(jnp.float32)

    # --- trunk: stack every folded conv3x3 / downsample conv1x1 ---
    w3s, b3s, wds, bds, has_ds = [], [], [], [], []
    for layer in params["layers"]:
        for blk in layer:
            for wkey, bnkey in (("conv1_w", "bn1"), ("conv2_w", "bn2")):
                w3, b3 = _prep_conv3x3_padded(blk[wkey], blk[bnkey])
                w3s.append(w3)
                b3s.append(b3)
            if blk["downsample"] is not None:
                wd, bd = _prep_conv1x1_padded(*blk["downsample"])
                wds.append(wd)
                bds.append(bd)
                has_ds.append(True)
            else:
                has_ds.append(False)
    arrays["w3"] = jnp.concatenate(w3s, axis=0)               # [n3*3, 3*128, 128] bf16
    arrays["b3"] = jnp.stack(b3s)                             # [n3, 1, 128] f32
    if wds:
        arrays["wd"] = jnp.stack(wds)                         # [nds, 128, 128] bf16
        arrays["bd"] = jnp.stack(bds)                         # [nds, 1, 128] f32
    else:
        arrays["wd"] = jnp.zeros((1, _CPAD, _CPAD), _ACT)
        arrays["bd"] = jnp.zeros((1, 1, _CPAD), jnp.float32)

    # --- classifier: pad classes to 128 lanes, stream weight as bf16 ---
    Cfc, nc = params["fc_w"].shape
    assert Cfc <= _CPAD
    ncp = _round_up(nc, 128)
    arrays["fc_w"] = jnp.pad(params["fc_w"],
                             ((0, _CPAD - Cfc), (0, ncp - nc))).astype(_ACT)
    arrays["fc_b"] = jnp.pad(params["fc_b"], (0, ncp - nc)).reshape(1, ncp).astype(jnp.float32)

    cfg = dict(block_has_ds=tuple(has_ds), num_classes=int(nc))
    return arrays, cfg


# ---------------------------------------------------------------------------
# Parameters (deterministic synthetic init, PyTorch shapes/structure)
# ---------------------------------------------------------------------------
def _init_conv(key, cout, cin, k):
    return 0.05 * jax.random.normal(key, (cout, cin, k, k), jnp.float32)


def _init_bn(key, c):
    k1, k2, k3, k4 = jax.random.split(key, 4)
    gamma = 1.0 + 0.1 * jax.random.normal(k1, (c,), jnp.float32)
    beta = 0.1 * jax.random.normal(k2, (c,), jnp.float32)
    mean = 0.1 * jax.random.normal(k3, (c,), jnp.float32)
    var = 1.0 + 0.1 * jnp.abs(jax.random.normal(k4, (c,), jnp.float32))
    return (gamma, beta, mean, var)


def init_residual_cnn(key, in_channels, num_classes, planes, num_blocks=2):
    keys = iter(jax.random.split(key, 512))
    params = {}
    params["conv1_w"] = _init_conv(next(keys), 32, in_channels, 7)
    params["bn1"] = _init_bn(next(keys), 32)

    in_ch = 32

    def make_layer(in_ch, plane, blocks):
        blocks = 1 if plane >= 512 else blocks            # mirrors _make_layer
        block_list = []
        downsample = None
        if in_ch != plane:                                # stride is always 1 here
            downsample = (_init_conv(next(keys), plane, in_ch, 1),
                          _init_bn(next(keys), plane))
        block_list.append({
            "conv1_w": _init_conv(next(keys), plane, in_ch, 3),
            "bn1": _init_bn(next(keys), plane),
            "conv2_w": _init_conv(next(keys), plane, plane, 3),
            "bn2": _init_bn(next(keys), plane),
            "downsample": downsample,
        })
        in_ch = plane
        for _ in range(1, blocks):
            block_list.append({
                "conv1_w": _init_conv(next(keys), plane, in_ch, 3),
                "bn1": _init_bn(next(keys), plane),
                "conv2_w": _init_conv(next(keys), plane, plane, 3),
                "bn2": _init_bn(next(keys), plane),
                "downsample": None,
            })
        return block_list, in_ch

    layers = []
    layer0, in_ch = make_layer(in_ch, 64, num_blocks)
    layers.append(layer0)
    for plane in planes:
        layer, in_ch = make_layer(in_ch, plane, num_blocks)
        layers.append(layer)
    params["layers"] = layers

    params["fc_w"] = 0.05 * jax.random.normal(next(keys), (planes[-1], num_classes), jnp.float32)
    params["fc_b"] = 0.05 * jax.random.normal(next(keys), (num_classes,), jnp.float32)
    return params


# ---------------------------------------------------------------------------
# Forward pass (two pallas_calls total)
# ---------------------------------------------------------------------------
def residual_cnn_forward(arrays, x_nchw, *, block_has_ds, num_classes):
    x = jnp.transpose(x_nchw, (0, 2, 3, 1))                          # NCHW -> NHWC
    x = stem_conv_bn_relu(x, arrays["stem_w"], arrays["stem_b"])     # 7x7 s2 + BN + ReLU
    x = maxpool_3x3_s2_p1(x)                                         # XLA max-tree
    N, H, W, _ = x.shape
    geom = _Geom(N, H, W)
    xflat = geom.to_flat(x)                                          # [N*Pa, 128] bf16
    logits = trunk_and_head(xflat, arrays, geom, block_has_ds=block_has_ds)
    return logits[:, :num_classes]


# ---------------------------------------------------------------------------
# Pure-JAX reference (inference-mode BN) for a numerical sanity check
# ---------------------------------------------------------------------------
def _ref_forward(params, x_nchw):
    def conv(x, w, stride, pad):
        return jax.lax.conv_general_dilated(
            x, w, (stride, stride), [(pad, pad), (pad, pad)],
            dimension_numbers=("NHWC", "OIHW", "NHWC"))

    def bn(x, p):
        gamma, beta, mean, var = p
        return (x - mean) * (gamma / jnp.sqrt(var + _BN_EPS)) + beta

    x = jnp.transpose(x_nchw, (0, 2, 3, 1))
    x = jax.nn.relu(bn(conv(x, params["conv1_w"], 2, 3), params["bn1"]))
    x = maxpool_3x3_s2_p1(x)
    for layer in params["layers"]:
        for blk in layer:
            h = jax.nn.relu(bn(conv(x, blk["conv1_w"], 1, 1), blk["bn1"]))
            h = bn(conv(h, blk["conv2_w"], 1, 1), blk["bn2"])
            if blk["downsample"] is None:
                s = x
            else:
                s = bn(conv(x, blk["downsample"][0], 1, 0), blk["downsample"][1])
            x = jax.nn.relu(h + s)
    pooled = jnp.mean(x, axis=(1, 2))
    return pooled @ params["fc_w"] + params["fc_b"]


# ---------------------------------------------------------------------------
if __name__ == "__main__":
    key = jax.random.PRNGKey(0)
    k_x, k_p = jax.random.split(key)

    in_channels, num_classes = 4, 10
    planes = (64, 128)
    x = jax.random.normal(k_x, (2, in_channels, 16, 16), jnp.float32)  # NCHW like PyTorch

    params = init_residual_cnn(k_p, in_channels, num_classes, planes, num_blocks=2)

    _roll_matches_jnp()                 # resolve roll convention once, outside jit

    arrays, cfg = pack_params(params)   # one-time weight fold / pack (review #7)
    fwd = jax.jit(functools.partial(residual_cnn_forward, **cfg))
    out = jax.block_until_ready(fwd(arrays, x))

    assert out.shape == (2, num_classes), out.shape
    assert bool(jnp.all(jnp.isfinite(out)))

    # Loose numerical check vs a plain-JAX inference-mode reference (bf16 weights
    # and MXU operands in the Pallas path; generous tolerance).
    ref = jax.block_until_ready(jax.jit(_ref_forward)(params, x))
    err = float(jnp.max(jnp.abs(out - ref)))
    scale = float(jnp.max(jnp.abs(ref)))
    assert err <= 0.08 * scale + 0.08, (err, scale)

    print("KERNEL_OK")
</pallas_src>

<mosaic_0001>
module attributes {stable_mosaic.version = 11 : i64} {
  func.func @k(%arg0: memref<8x128xf32, #tpu.memory_space<vmem>>, %arg1: memref<8x128xf32, #tpu.memory_space<vmem>>) attributes {dimension_semantics = [], scalar_prefetch = 0 : i64, scratch_operands = 0 : i64, tpu.core_type = #tpu.core_type<tc>} {
    %c0 = arith.constant 0 : index
    %c0_0 = arith.constant 0 : index
    %0 = vector.load %arg0[%c0, %c0_0] : memref<8x128xf32, #tpu.memory_space<vmem>>, vector<8x128xf32>
    %c1_i32 = arith.constant 1 : i32
    %1 = tpu.dynamic_rotate %0 by %c1_i32 dim 0 : vector<8x128xf32>, i32 -> vector<8x128xf32>
    %c0_1 = arith.constant 0 : index
    %c0_2 = arith.constant 0 : index
    %2 = vector.load %arg1[%c0_1, %c0_2] : memref<8x128xf32, #tpu.memory_space<vmem>>, vector<8x128xf32>
    tpu.vector_store %arg1[%c0_1, %c0_2], %1 {strides = array<i32>} : memref<8x128xf32, #tpu.memory_space<vmem>>, vector<8x128xf32>,
    return
  }
}

</mosaic_0001>

<bundles_post_ra>
// kernel: tpu_custom_call.1
= control target key start
LH: loop header
LB: loop body
LE: loop exit
PB: predicated region body
PF: predicated region fallthrough
CT: control target
= control target key end

     0   :  { %6 = vsyncpa [#allocation3], 0  ;;  %s103_s0 = inlined_call_operand.hbm [shape: f32[8,128], index: 0, kind: input, shape index: {}]   ;;  %s104_s1 = inlined_call_operand.hbm [shape: f32[8,128], index: 1, kind: output, shape index: {}]  }
   0x1   :  { %7 = vsyncpa [#allocation4], 0  ;;  %s85_s6 = smov [#allocation2]  }
   0x2   :  { %s14_s7 = sshll.u32 %s85_s6, 4  ;;  %s15_s7 = int_to_ptr.vmem [resolvable:$true] %s14_s7 }
   0x3   :  { %s49_s8 = scalar_lea.vmem %s15_s7, 128  ;;  %p54_p1 = scmp.lt.s32.totalorder %s15_s7, %s15_s7 }
   0x4   :  { %p50_p0 = scmp.ne.s32.totalorder %s15_s7, %s49_s8  ;;  %p55_p2 = scmp.lt.s32.totalorder %s49_s8, %s49_s8 }
   0x6   :  { %p56_p3 = por %p55_p2, %p54_p1 }
   0x8   :  { %p57_p4 = pnand %p56_p3, %p50_p0 }
   0xa   :  { %60 = shalt.err (!%p57_p4)
}
   0xb   :  { %17 = dma.hbm_to_vmem [thread:$0]  %s103_s0, 128, %s15_s7, [#allocation3]  }
   0xc   :  { %81 = dma.done.wait [#allocation3], 128  }
   0xd   :  { %82 = vsyncadd [#allocation3], 4294967168  ;;  %s86_s11 = smov [#allocation5]   ;;  %v21_v0 = vld [vmem:[#allocation2] sm:$0xff] }
   0xe   :  { %s30_s12 = sshll.u32 %s86_s11, 4  ;;  %v22_v1 = vrot.slane %v21_v0, 7  ;;  %s31_s12 = int_to_ptr.vmem [resolvable:$true] %s30_s12 }
   0xf   :  { %s61_s13 = scalar_lea.vmem %s31_s12, 128  ;;  %p66_p6 = scmp.lt.s32.totalorder %s31_s12, %s31_s12 }
  0x10   :  { %23 = vst [vmem:[#allocation5] sm:$0xff] %v22_v1  ;;  %p62_p5 = scmp.ne.s32.totalorder %s31_s12, %s61_s13  ;;  %p67_p7 = scmp.lt.s32.totalorder %s61_s13, %s61_s13 }
  0x12   :  { %p68_p8 = por %p67_p7, %p66_p6 }
  0x14   :  { %p69_p9 = pnand %p68_p8, %p62_p5 }
  0x16   :  { %72 = shalt.err (!%p69_p9)
}
  0x17   :  { %33 = dma.vmem_to_hbm [thread:$0]  %s31_s12, 128, %s104_s1, [#allocation4]  }
  0x18   :  { %83 = dma.done.wait [#allocation4], 128  }
  0x19   :  { %84 = vsyncadd [#allocation4], 4294967168 }
  0x1a   :  { %37 = vsyncpa [#allocation3], 1 }
  0x1b   :  { %38 = vsyncpa [#allocation4], 1 }

</bundles_post_ra>
